<compile_context>
chip_gen: v7x
topology: tpu7x:2x2x1
jax: 0.10.0
libtpu: 0.0.40
codegen_flags: <defaults>
</compile_context>

<pallas_src>
import jax
import jax.numpy as jnp
from jax.experimental import pallas as pl
from jax.experimental.pallas import tpu as pltpu

HIDDEN = 768                       # fixed by the module (nn.Linear(768, output_dim))
LANE = 128
SEQ_TILE = 256                     # seq chunk (multiple of 128) when S is large
TILE_BYTES_BUDGET = 2 * 1024 * 1024  # target bf16 hidden bytes per grid step


# --------------------------------------------------------------------------
# Kernels
# --------------------------------------------------------------------------
def _pool_project_kernel(hidden_ref, mask_ref, w_ref, b_ref, out_ref,
                         acc_ref, den_ref):
    """Masked-sum accumulate one (TB, TS, H) chunk; divide + project at the end.

    hidden_ref : (TB, TS, H) bf16/f32  last_hidden_state chunk
    mask_ref   : (TB, TS)    f32       attention_mask chunk (zero-padded)
    w_ref      : (H, Dp)     f32       projection weight (lane-padded, resident)
    b_ref      : (1, Dp)     f32       projection bias   (lane-padded, resident)
    out_ref    : (TB, Dp)    f32
    acc_ref    : (TB, H)     f32       scratch: running masked sum
    den_ref    : (TB, 1)     f32       scratch: running mask sum
    """
    s = pl.program_id(1)

    @pl.when(s == 0)
    def _():
        acc_ref[...] = jnp.zeros_like(acc_ref)
        den_ref[...] = jnp.zeros_like(den_ref)

    mask = mask_ref[...]                                    # (TB, TS)
    h = hidden_ref[...].astype(jnp.float32)                 # one upcast / chunk
    # masked_fill semantics; also neutralizes garbage read from ragged
    # (out-of-bounds) hidden blocks because the mask is zero-padded.
    masked = jnp.where(mask[:, :, None] != 0.0, h, 0.0)
    acc_ref[...] += jnp.sum(masked, axis=1)                 # (TB, H) f32
    den_ref[...] += jnp.sum(mask, axis=1, keepdims=True)    # (TB, 1) f32

    @pl.when(s == pl.num_programs(1) - 1)
    def _():
        # Exact divide AFTER the reduction (touches only TB*H elements).
        # NOTE: like the PyTorch module, an all-zero mask row yields Inf/NaN.
        pooled = acc_ref[...] / den_ref[...]
        out = jnp.dot(pooled, w_ref[...],
                      preferred_element_type=jnp.float32) + b_ref[...]
        out_ref[...] = out.astype(out_ref.dtype)


def _pool_only_kernel(hidden_ref, mask_ref, out_ref, acc_ref, den_ref):
    """Identity-projection branch: masked average pool only."""
    s = pl.program_id(1)

    @pl.when(s == 0)
    def _():
        acc_ref[...] = jnp.zeros_like(acc_ref)
        den_ref[...] = jnp.zeros_like(den_ref)

    mask = mask_ref[...]
    h = hidden_ref[...].astype(jnp.float32)
    masked = jnp.where(mask[:, :, None] != 0.0, h, 0.0)
    acc_ref[...] += jnp.sum(masked, axis=1)
    den_ref[...] += jnp.sum(mask, axis=1, keepdims=True)

    @pl.when(s == pl.num_programs(1) - 1)
    def _():
        out_ref[...] = (acc_ref[...] / den_ref[...]).astype(out_ref.dtype)


# --------------------------------------------------------------------------
# Wrapper helpers
# --------------------------------------------------------------------------
def _vmem_limit_bytes():
    """Explicit scoped-VMEM limit. The defaults (16/32/32 MiB on v5e/v6e/v7x)
    are too small for the resident weight + double-buffered hidden chunks;
    stay well under physical VMEM (128 MiB on v5e/v6e, 64 MiB on v7x)."""
    cap = 64 * 1024 * 1024                 # conservative fallback (v7x physical)
    try:
        cap = int(pltpu.get_tpu_info().vmem_capacity_bytes)
    except Exception:
        pass
    # v5e/v6e -> 96 MiB, v7x -> 48 MiB; never below what the largest tiles need
    return max(48 * 1024 * 1024, min(cap * 3 // 4, 100 * 1024 * 1024))


def _pick_tiles(B, S):
    """Pick (TB, TS) satisfying the (8,128) block constraints without padding
    the hidden states, and keeping per-step VMEM small and S-independent."""
    # Sequence chunk: full S when small, else a 128-multiple chunk (ragged tail
    # handled by zero-padding only the tiny mask).
    TS = S if S <= SEQ_TILE else SEQ_TILE
    if B <= 8:
        # block == full batch extent satisfies the (8,128) rule for any B
        TB = B
    else:
        # multiples of 8 only; size so the bf16 hidden chunk is ~2 MiB, which
        # keeps the double-buffered input plus f32 temporaries comfortably
        # inside every generation's VMEM.
        tb = TILE_BYTES_BUDGET // (TS * HIDDEN * 2)
        tb = min(128, max(8, (tb // 8) * 8))
        # v7x megacore: keep >= 2 steps on the parallel batch axis
        tb = min(tb, max(8, (pl.cdiv(B, 2) // 8) * 8))
        TB = tb
    return TB, TS


def pool_and_project(last_hidden_state, attention_mask, weight=None, bias=None):
    """Masked mean-pool over seq + (optional) projection. weight=None => Identity."""
    B, S, H = last_hidden_state.shape
    assert H == HIDDEN
    itemsize = jnp.dtype(last_hidden_state.dtype).itemsize

    TB, TS = _pick_tiles(B, S)
    n_b, n_s = pl.cdiv(B, TB), pl.cdiv(S, TS)
    B_pad, S_pad = n_b * TB, n_s * TS

    # Only the tiny mask is padded (with zeros).  last_hidden_state is never
    # copied/padded: ragged blocks read out-of-bounds garbage that the
    # jnp.where(mask != 0, ...) in the kernel maps to exact zeros, and
    # out-of-bounds output rows are dropped by Pallas on writeback.
    mask_f = attention_mask.astype(jnp.float32)
    if (B_pad, S_pad) != (B, S):
        mask_f = jnp.pad(mask_f, ((0, B_pad - B), (0, S_pad - S)))

    hidden = last_hidden_state            # keep the backbone's native dtype (bf16)

    compiler_params = pltpu.CompilerParams(
        dimension_semantics=("parallel", "arbitrary"),
        vmem_limit_bytes=_vmem_limit_bytes())

    hidden_spec = pl.BlockSpec((TB, TS, H), lambda b, s: (b, s, 0))
    mask_spec = pl.BlockSpec((TB, TS), lambda b, s: (b, s))
    scratch = [pltpu.VMEM((TB, H), jnp.float32),    # pooled-sum accumulator
               pltpu.VMEM((TB, 1), jnp.float32)]    # mask-sum accumulator

    if weight is None:
        # torch.nn.Identity() branch: pooling only (no weight DMA, no matmul).
        out = pl.pallas_call(
            _pool_only_kernel,
            out_shape=jax.ShapeDtypeStruct((B, H), jnp.float32),
            grid=(n_b, n_s),
            in_specs=[hidden_spec, mask_spec],
            out_specs=pl.BlockSpec((TB, H), lambda b, s: (b, 0)),
            scratch_shapes=scratch,
            compiler_params=compiler_params,
            cost_estimate=pl.CostEstimate(
                flops=2 * B * S * H,
                transcendentals=0,
                bytes_accessed=(B * S * H * itemsize
                                + B_pad * S_pad * 4 + B * H * 4)),
        )(hidden, mask_f)
        return out

    H2, D = weight.shape
    assert H2 == HIDDEN
    # Lane-dense output stores / MXU N dim: pad projection dim to 128 multiple.
    D_pad = pl.cdiv(D, LANE) * LANE
    w = weight.astype(jnp.float32)        # exact parity with the f32 nn.Linear
    b2d = bias.astype(jnp.float32).reshape(1, D)
    if D_pad != D:
        w = jnp.pad(w, ((0, 0), (0, D_pad - D)))
        b2d = jnp.pad(b2d, ((0, 0), (0, D_pad - D)))

    out = pl.pallas_call(
        _pool_project_kernel,
        out_shape=jax.ShapeDtypeStruct((B, D_pad), jnp.float32),
        grid=(n_b, n_s),
        in_specs=[
            hidden_spec,
            mask_spec,
            pl.BlockSpec((H, D_pad), lambda b, s: (0, 0)),   # resident weight
            pl.BlockSpec((1, D_pad), lambda b, s: (0, 0)),   # resident bias
        ],
        out_specs=pl.BlockSpec((TB, D_pad), lambda b, s: (b, 0)),
        scratch_shapes=scratch,
        compiler_params=compiler_params,
        cost_estimate=pl.CostEstimate(
            flops=2 * B * S * H + 2 * B * H * D_pad,
            transcendentals=0,
            bytes_accessed=(B * S * H * itemsize + B_pad * S_pad * 4
                            + H * D_pad * 4 + D_pad * 4 + B * D_pad * 4)),
    )(hidden, mask_f, w, b2d)
    return out[:, :D] if D_pad != D else out


# --------------------------------------------------------------------------
# Module analogue
# --------------------------------------------------------------------------
class CustomTextEmbeddingModelJAX:
    """JAX/Pallas analogue of CustomTextEmbeddingModel (synthetic weights)."""

    def __init__(self, output_dim, vocab_size=100, key=None):
        key = jax.random.PRNGKey(0) if key is None else key
        k_emb, k_w, k_b = jax.random.split(key, 3)
        # TODO(synk): the wrapped transformer ("original_model") is not
        # reimplemented; it is approximated by a deterministic bf16 embedding
        # lookup producing last_hidden_state.
        self.embedding = (jax.random.normal(
            k_emb, (vocab_size, HIDDEN), jnp.float32) * 0.02
        ).astype(jnp.bfloat16)
        self.output_dim = output_dim
        if output_dim == HIDDEN:
            # torch.nn.Identity() branch — no projection weights at all
            self.weight = None
            self.bias = None
        else:
            # torch.nn.Linear(768, output_dim) with default-style init
            bound = 1.0 / float(HIDDEN) ** 0.5
            self.weight = jax.random.uniform(
                k_w, (HIDDEN, output_dim), jnp.float32, -bound, bound)
            self.bias = jax.random.uniform(
                k_b, (output_dim,), jnp.float32, -bound, bound)

    def __call__(self, input_ids, attention_mask):
        # "original_model" stand-in (glue, not part of the kernel); bf16 output.
        # TODO(synk): when the producer really is this simple gather, it could
        # be fused into the kernel via scalar-prefetched input_ids to avoid
        # materializing (B, S, 768) in HBM.
        last_hidden_state = self.embedding[input_ids]        # (B, S, 768) bf16
        return pool_and_project(last_hidden_state, attention_mask,
                                self.weight, self.bias)


# --------------------------------------------------------------------------
# Reference & test
# --------------------------------------------------------------------------
def _reference(last_hidden_state, attention_mask, weight=None, bias=None):
    h = last_hidden_state.astype(jnp.float32)
    m = attention_mask.astype(jnp.float32)
    masked = jnp.where(m[:, :, None] != 0, h, 0.0)           # masked_fill
    pooled = masked.sum(axis=1) / m.sum(axis=1, keepdims=True)
    if weight is None:
        return pooled
    return pooled @ weight + bias


if __name__ == "__main__":
    key = jax.random.PRNGKey(0)
    k_ids, k_model, k_len, k_ids2 = jax.random.split(key, 4)

    # --- Test 1: projection branch (output_dim != 768), small shapes -------
    B, S, D_OUT, VOCAB = 2, 8, 32, 100
    input_ids = jax.random.randint(k_ids, (B, S), 0, VOCAB, dtype=jnp.int32)
    attention_mask = jnp.array(
        [[1, 1, 1, 1, 1, 1, 1, 1],
         [1, 1, 1, 1, 1, 0, 0, 0]], dtype=jnp.int32)

    model = CustomTextEmbeddingModelJAX(output_dim=D_OUT, vocab_size=VOCAB,
                                        key=k_model)
    out = jax.block_until_ready(model(input_ids, attention_mask))
    ref = _reference(model.embedding[input_ids], attention_mask,
                     model.weight, model.bias)
    assert out.shape == (B, D_OUT)
    assert jnp.allclose(out, ref, atol=2e-4, rtol=1e-3), (
        float(jnp.max(jnp.abs(out - ref))))

    # --- Test 2: Identity branch (output_dim == 768) -----------------------
    model_id = CustomTextEmbeddingModelJAX(output_dim=HIDDEN, vocab_size=VOCAB,
                                           key=k_model)
    out_id = jax.block_until_ready(model_id(input_ids, attention_mask))
    ref_id = _reference(model_id.embedding[input_ids], attention_mask)
    assert out_id.shape == (B, HIDDEN)
    assert jnp.allclose(out_id, ref_id, atol=2e-4, rtol=1e-3), (
        float(jnp.max(jnp.abs(out_id - ref_id))))

    # --- Test 3: multi-block grid with ragged batch & seq tiles ------------
    B3, S3, D3 = 10, 384, 200
    ids3 = jax.random.randint(k_ids2, (B3, S3), 0, VOCAB, dtype=jnp.int32)
    lens = jax.random.randint(k_len, (B3,), 1, S3 + 1)
    mask3 = (jnp.arange(S3)[None, :] < lens[:, None]).astype(jnp.int32)
    model3 = CustomTextEmbeddingModelJAX(output_dim=D3, vocab_size=VOCAB,
                                         key=k_model)
    out3 = jax.block_until_ready(model3(ids3, mask3))
    ref3 = _reference(model3.embedding[ids3], mask3, model3.weight, model3.bias)
    assert out3.shape == (B3, D3)
    assert jnp.allclose(out3, ref3, atol=2e-4, rtol=1e-3), (
        float(jnp.max(jnp.abs(out3 - ref3))))

    print("KERNEL_OK")
</pallas_src>

<mosaic_0001>
module attributes {stable_mosaic.version = 11 : i64} {
  func.func @_pool_project_kernel(%arg0: i32, %arg1: i32, %arg2: memref<2x8x768xbf16, #tpu.memory_space<vmem>>, %arg3: memref<2x8xf32, #tpu.memory_space<vmem>>, %arg4: memref<768x128xf32, #tpu.memory_space<vmem>>, %arg5: memref<1x128xf32, #tpu.memory_space<vmem>>, %arg6: memref<2x128xf32, #tpu.memory_space<vmem>>, %arg7: memref<2x768xf32, #tpu.memory_space<vmem>>, %arg8: memref<2x1xf32, #tpu.memory_space<vmem>>) attributes {dimension_semantics = [#tpu.dimension_semantics<parallel>, #tpu.dimension_semantics<arbitrary>], iteration_bounds = array<i64: 1, 1>, scalar_prefetch = 0 : i64, scratch_operands = 2 : i64, tpu.core_type = #tpu.core_type<tc>, window_params = [{transform_indices = @transform_0, window_bounds = array<i64: 2, 8, 768>}, {transform_indices = @transform_1, window_bounds = array<i64: 2, 8>}, {pipeline_mode = #tpu.pipeline_mode<synchronous>, transform_indices = @transform_2, window_bounds = array<i64: 768, 128>}, {pipeline_mode = #tpu.pipeline_mode<synchronous>, transform_indices = @transform_3, window_bounds = array<i64: 1, 128>}, {transform_indices = @transform_4, window_bounds = array<i64: 2, 128>}]} {
    %c0_i32 = arith.constant 0 : i32
    %0 = arith.cmpi eq, %arg1, %c0_i32 : i32
    %1 = arith.extui %0 : i1 to i32
    %c0_i32_0 = arith.constant 0 : i32
    %2 = arith.cmpi ne, %1, %c0_i32_0 : i32
    scf.if %2 {
      %cst_18 = arith.constant 0.000000e+00 : f32
      %25 = vector.broadcast %cst_18 : f32 to vector<2x768xf32>
      %c0_19 = arith.constant 0 : index
      %c0_20 = arith.constant 0 : index
      %26 = vector.load %arg7[%c0_19, %c0_20] : memref<2x768xf32, #tpu.memory_space<vmem>>, vector<2x768xf32>
      tpu.vector_store %arg7[%c0_19, %c0_20], %25 {strides = array<i32>} : memref<2x768xf32, #tpu.memory_space<vmem>>, vector<2x768xf32>,
      %cst_21 = arith.constant 0.000000e+00 : f32
      %27 = vector.broadcast %cst_21 : f32 to vector<2x1xf32>
      %c0_22 = arith.constant 0 : index
      %c0_23 = arith.constant 0 : index
      %28 = vector.load %arg8[%c0_22, %c0_23] : memref<2x1xf32, #tpu.memory_space<vmem>>, vector<2x1xf32>
      tpu.vector_store %arg8[%c0_22, %c0_23], %27 {strides = array<i32>} : memref<2x1xf32, #tpu.memory_space<vmem>>, vector<2x1xf32>,
    } else {
    }
    %c0 = arith.constant 0 : index
    %c0_1 = arith.constant 0 : index
    %3 = vector.load %arg3[%c0, %c0_1] : memref<2x8xf32, #tpu.memory_space<vmem>>, vector<2x8xf32>
    %c0_2 = arith.constant 0 : index
    %c0_3 = arith.constant 0 : index
    %c0_4 = arith.constant 0 : index
    %4 = vector.load %arg2[%c0_2, %c0_3, %c0_4] : memref<2x8x768xbf16, #tpu.memory_space<vmem>>, vector<2x8x768xbf16>
    %5 = arith.extf %4 : vector<2x8x768xbf16> to vector<2x8x768xf32>
    %6 = vector.shape_cast %3 : vector<2x8xf32> to vector<2x8x1xf32>
    %cst = arith.constant 0.000000e+00 : f32
    %7 = vector.broadcast %cst : f32 to vector<2x8x1xf32>
    %8 = arith.cmpf one, %6, %7 : vector<2x8x1xf32>
    %cst_5 = arith.constant 0.000000e+00 : f32
    %9 = vector.shape_cast %8 : vector<2x8x1xi1> to vector<2x8x1xi1>
    %10 = vector.broadcast %9 : vector<2x8x1xi1> to vector<2x8x768xi1>
    %11 = vector.broadcast %cst_5 : f32 to vector<2x8x768xf32>
    %12 = arith.select %10, %5, %11 : vector<2x8x768xi1>, vector<2x8x768xf32>
    %c0_6 = arith.constant 0 : index
    %c0_7 = arith.constant 0 : index
    %13 = vector.load %arg7[%c0_6, %c0_7] : memref<2x768xf32, #tpu.memory_space<vmem>>, vector<2x768xf32>
    %cst_8 = arith.constant dense<0.000000e+00> : vector<2x768xf32>
    %14 = vector.multi_reduction <add>, %12, %cst_8 [1] : vector<2x8x768xf32> to vector<2x768xf32>
    %15 = arith.addf %13, %14 : vector<2x768xf32>
    %c0_9 = arith.constant 0 : index
    %c0_10 = arith.constant 0 : index
    %16 = vector.load %arg7[%c0_9, %c0_10] : memref<2x768xf32, #tpu.memory_space<vmem>>, vector<2x768xf32>
    tpu.vector_store %arg7[%c0_9, %c0_10], %15 {strides = array<i32>} : memref<2x768xf32, #tpu.memory_space<vmem>>, vector<2x768xf32>,
    %c0_11 = arith.constant 0 : index
    %c0_12 = arith.constant 0 : index
    %17 = vector.load %arg8[%c0_11, %c0_12] : memref<2x1xf32, #tpu.memory_space<vmem>>, vector<2x1xf32>
    %cst_13 = arith.constant dense<0.000000e+00> : vector<2xf32>
    %18 = vector.multi_reduction <add>, %3, %cst_13 [1] : vector<2x8xf32> to vector<2xf32>
    %19 = vector.shape_cast %18 : vector<2xf32> to vector<2x1xf32>
    %20 = arith.addf %17, %19 : vector<2x1xf32>
    %c0_14 = arith.constant 0 : index
    %c0_15 = arith.constant 0 : index
    %21 = vector.load %arg8[%c0_14, %c0_15] : memref<2x1xf32, #tpu.memory_space<vmem>>, vector<2x1xf32>
    tpu.vector_store %arg8[%c0_14, %c0_15], %20 {strides = array<i32>} : memref<2x1xf32, #tpu.memory_space<vmem>>, vector<2x1xf32>,
    %c0_i32_16 = arith.constant 0 : i32
    %22 = arith.cmpi eq, %arg1, %c0_i32_16 : i32
    %23 = arith.extui %22 : i1 to i32
    %c0_i32_17 = arith.constant 0 : i32
    %24 = arith.cmpi ne, %23, %c0_i32_17 : i32
    scf.if %24 {
      %c0_18 = arith.constant 0 : index
      %c0_19 = arith.constant 0 : index
      %25 = vector.load %arg7[%c0_18, %c0_19] : memref<2x768xf32, #tpu.memory_space<vmem>>, vector<2x768xf32>
      %c0_20 = arith.constant 0 : index
      %c0_21 = arith.constant 0 : index
      %26 = vector.load %arg8[%c0_20, %c0_21] : memref<2x1xf32, #tpu.memory_space<vmem>>, vector<2x1xf32>
      %27 = vector.broadcast %26 : vector<2x1xf32> to vector<2x768xf32>
      %28 = arith.divf %25, %27 : vector<2x768xf32>
      %c0_22 = arith.constant 0 : index
      %c0_23 = arith.constant 0 : index
      %29 = vector.load %arg4[%c0_22, %c0_23] : memref<768x128xf32, #tpu.memory_space<vmem>>, vector<768x128xf32>
      %cst_24 = arith.constant dense<0.000000e+00> : vector<2x128xf32>
      %30 = tpu.matmul %28, %29, %cst_24 {dimension_numbers = #tpu.dot_dimension_numbers<[1], [0], [0], [1], [0, 0, 1, 1], [], []>} : vector<2x768xf32>, vector<768x128xf32>, vector<2x128xf32> -> vector<2x128xf32>
      %c0_25 = arith.constant 0 : index
      %c0_26 = arith.constant 0 : index
      %31 = vector.load %arg5[%c0_25, %c0_26] : memref<1x128xf32, #tpu.memory_space<vmem>>, vector<1x128xf32>
      %32 = vector.broadcast %31 : vector<1x128xf32> to vector<2x128xf32>
      %33 = arith.addf %30, %32 : vector<2x128xf32>
      %c0_27 = arith.constant 0 : index
      %c0_28 = arith.constant 0 : index
      %34 = vector.load %arg6[%c0_27, %c0_28] : memref<2x128xf32, #tpu.memory_space<vmem>>, vector<2x128xf32>
      tpu.vector_store %arg6[%c0_27, %c0_28], %33 {strides = array<i32>} : memref<2x128xf32, #tpu.memory_space<vmem>>, vector<2x128xf32>,
    } else {
    }
    return
  }
  func.func @transform_0(%arg0: i32, %arg1: i32) -> (i32, i32, i32) {
    %c0_i32 = arith.constant 0 : i32
    %c0_i32_0 = arith.constant 0 : i32
    return %arg0, %arg1, %c0_i32 : i32, i32, i32
  }
  func.func @transform_1(%arg0: i32, %arg1: i32) -> (i32, i32) {
    %c0_i32 = arith.constant 0 : i32
    return %arg0, %arg1 : i32, i32
  }
  func.func @transform_2(%arg0: i32, %arg1: i32) -> (i32, i32) {
    %c0_i32 = arith.constant 0 : i32
    %c0_i32_0 = arith.constant 0 : i32
    %c0_i32_1 = arith.constant 0 : i32
    return %c0_i32, %c0_i32_0 : i32, i32
  }
  func.func @transform_3(%arg0: i32, %arg1: i32) -> (i32, i32) {
    %c0_i32 = arith.constant 0 : i32
    %c0_i32_0 = arith.constant 0 : i32
    %c0_i32_1 = arith.constant 0 : i32
    return %c0_i32, %c0_i32_0 : i32, i32
  }
  func.func @transform_4(%arg0: i32, %arg1: i32) -> (i32, i32) {
    %c0_i32 = arith.constant 0 : i32
    %c0_i32_0 = arith.constant 0 : i32
    return %arg0, %c0_i32 : i32, i32
  }
}

</mosaic_0001>

<bundles_post_ra>
// kernel: tpu_custom_call.1
= control target key start
LH: loop header
LB: loop body
LE: loop exit
PB: predicated region body
PF: predicated region fallthrough
CT: control target
= control target key end

     0   :  { %9 = vsyncpa [#allocation5], 0  ;;  %s1067_s0 = inlined_call_operand.hbm [shape: bf16[2,8,768], index: 0, kind: input, shape index: {}]   ;;  %s1068_s1 = inlined_call_operand.vmem [shape: f32[2,8], index: 1, kind: input, shape index: {}]   ;;  %s1069_s2 = inlined_call_operand.hbm [shape: f32[768,128], index: 2, kind: input, shape index: {}]   ;;  %s1070_s3 = inlined_call_operand.vmem [shape: f32[1,128], index: 3, kind: input, shape index: {}]   ;;  %s1071_s4 = inlined_call_operand.hbm [shape: f32[2,128], index: 4, kind: output, shape index: {}]  }
   0x1   :  { %10 = vsyncpa [#allocation8], 0 }
   0x2   :  { %11 = vsyncpa [#allocation6], 0  ;;  %s948_s15 = smov [#allocation4]   ;;  %s876_s19 = scalar_lea.hbm %s1067_s0, 768 }
   0x3   :  { %s17_s16 = sshll.u32 %s948_s15, 4  ;;  %p877_p0 = scmp.ne.s32.totalorder %s1067_s0, %s876_s19  ;;  %s18_s16 = int_to_ptr.vmem [resolvable:$true] %s17_s16 }
   0x4   :  { %p880_p1 = scmp.lt.u32.totalorder %s876_s19, %s1067_s0 }
   0x6   :  { %p882_p2 = pnand %p880_p1, %p877_p0 }
   0x8   :  { %885 = shalt.err (!%p882_p2)
}
   0x9   :  { %s886_s24 = scalar_lea.vmem %s18_s16, 768  ;;  %p891_p4 = scmp.lt.s32.totalorder %s18_s16, %s18_s16 }
   0xa   :  { %p887_p3 = scmp.ne.s32.totalorder %s18_s16, %s886_s24  ;;  %p892_p5 = scmp.lt.s32.totalorder %s886_s24, %s886_s24 }
   0xc   :  { %p893_p6 = por %p892_p5, %p891_p4 }
   0xe   :  { %p894_p7 = pnand %p893_p6, %p887_p3 }
  0x10   :  { %897 = shalt.err (!%p894_p7)
}
  0x11   :  { %s949_s25 = smov 384   ;;  %s950_s26 = smov 24  }
  0x12   :  { %23 = dma.hbm_to_vmem [thread:$0]  %s1067_s0, 768, %s18_s16, [#allocation5], %s949_s25, %s949_s25, %s950_s26  }
  0x13   :  { %s951_s29 = smov [#allocation7]   ;;  %s898_s7 = scalar_lea.hbm %s1069_s2, 12288 }
  0x14   :  { %s31_s30 = sshll.u32 %s951_s29, 4  ;;  %p899_p8 = scmp.ne.s32.totalorder %s1069_s2, %s898_s7  ;;  %s32_s30 = int_to_ptr.vmem [resolvable:$true] %s31_s30 }
  0x15   :  { %p902_p9 = scmp.lt.u32.totalorder %s898_s7, %s1069_s2 }
  0x17   :  { %p904_p10 = pnand %p902_p9, %p899_p8 }
  0x19   :  { %907 = shalt.err (!%p904_p10)
}
  0x1a   :  { %s908_s12 = scalar_lea.vmem %s32_s30, 12288  ;;  %p913_p12 = scmp.lt.s32.totalorder %s32_s30, %s32_s30 }
  0x1b   :  { %p909_p11 = scmp.ne.s32.totalorder %s32_s30, %s908_s12  ;;  %p914_p13 = scmp.lt.s32.totalorder %s908_s12, %s908_s12 }
  0x1d   :  { %p915_p0 = por %p914_p13, %p913_p12 }
  0x1f   :  { %p916_p1 = pnand %p915_p0, %p909_p11 }
  0x21   :  { %919 = shalt.err (!%p916_p1)
}
  0x22   :  { %s952_s0 = smov 128   ;;  %s953_s13 = smov 8  }
  0x23   :  { %37 = dma.hbm_to_vmem [thread:$0]  %s1069_s2, 12288, %s32_s30, [#allocation8], %s952_s0, %s952_s0, %s953_s13  }
  0x24   :  { %942 = dma.done.wait [#allocation5], 768  }
  0x25   :  { %943 = vsyncadd [#allocation5], 4294966528 }
  0x26   :  { %944 = dma.done.wait [#allocation8], 12288  }
  0x27   :  { %945 = vsyncadd [#allocation8], 4294955008  ;;  %v73_v0 = vlaneseq  ;;  %vm52_vm0 = vcmask 1024   ;;  %v954_v1 = vmov 0.0   ;;  %vm268_vm1 = vcmask 58368   ;;  %v312_v10 = vld [vmem:[#allocation7 + $0x80] sm:$0xff] }
  0x28   :  { %51 = vst [vmem:[#allocation2 + $0x8] sm:$0xf] %v954_v1  ;;  %53 = vst.msk [vmem:[#allocation3] sm:$0x3] %vm52_vm0, %v954_v1  ;;  %v54_v4 = vld [vmem:[%s1068_s1] sm:$0x3] }
  0x29   :  { %v1008_v2 = vshrl.u32 %v73_v0, 7  ;;  %v269_v5 = vsel %vm268_vm1, %v54_v4, 0.0  ;;  %v955_v8 = vmov 0   ;;  %v313_v11 = vld [vmem:[#allocation7 + $0x88] sm:$0xff]  ;;  %v296_v12 = vld [vmem:[#allocation7] sm:$0xff]  ;;  %v314_v19 = vld [vmem:[#allocation7 + $0x90] sm:$0xff] }
  0x2a   :  { %270 = vadd.xlane.f32.xlu0 %v269_v5  ;;  %872 = vset.pattern.permute.xlu1 %v955_v8  ;;  %v765_v13 = vpack.c.bf16 %v313_v11, %v312_v10  ;;  %v297_v14 = vld [vmem:[#allocation7 + $0x8] sm:$0xff]  ;;  %v344_v15 = vld [vmem:[#allocation7 + $0x180] sm:$0xff]  ;;  %v315_v20 = vld [vmem:[#allocation7 + $0x98] sm:$0xff]  ;;  %vm246_vm4 = vcmask 1041409   ;;  %vm248_vm5 = vcmask 1043459   ;;  %vm250_vm6 = vcmask 1045509  }
  0x2b   :  { %v75_v3 = vsub.s32 0, %v1008_v2  ;;  %v82_v7 = vsub.s32 1, %v1008_v2  ;;  %873 = vset.pattern.permute.xlu0 %v955_v8  ;;  %v345_v16 = vld [vmem:[#allocation7 + $0x188] sm:$0xff]  ;;  %v767_v17 = vpack.c.bf16 %v297_v14, %v296_v12  ;;  %v328_v21 = vld [vmem:[#allocation7 + $0x100] sm:$0xff]  ;;  %v769_v22 = vpack.c.bf16 %v315_v20, %v314_v19  ;;  %v298_v24 = vld [vmem:[#allocation7 + $0x10] sm:$0xff]  ;;  %s958_s18 = smov [#allocation9]  }
  0x2c   :  { %v797_v18 = vpack.c.bf16 %v345_v16, %v344_v15  ;;  %766 = vmatprep.subr.bf16.mxu0 %v765_v13  ;;  %v329_v23 = vld [vmem:[#allocation7 + $0x108] sm:$0xff]  ;;  %v299_v25 = vld [vmem:[#allocation7 + $0x18] sm:$0xff]  ;;  %v346_v28 = vld [vmem:[#allocation7 + $0x190] sm:$0xff]  ;;  %vm252_vm7 = vcmask 1047559   ;;  %s649_s19 = sshll.u32 %s958_s18, 4  ;;  %s650_s19 = int_to_ptr.vmem [resolvable:$true] %s649_s19 }
  0x2d   :  { %v76_v6 = vrot.slane %v54_v4, %v75_v3  ;;  %v83_v9 = vrot.slane %v54_v4, %v82_v7  ;;  %768 = vmatpush3.bf16.msra.mxu0 %v767_v17  ;;  %v799_v26 = vpack.c.bf16 %v329_v23, %v328_v21  ;;  %v771_v27 = vpack.c.bf16 %v299_v25, %v298_v24  ;;  %v347_v29 = vld [vmem:[#allocation7 + $0x198] sm:$0xff]  ;;  %v316_v30 = vld [vmem:[#allocation7 + $0xa0] sm:$0xff]  ;;  %v317_v32 = vld [vmem:[#allocation7 + $0xa8] sm:$0xff]  ;;  %s920_s20 = scalar_lea.vmem %s650_s19, 32  ;;  %p925_p3 = scmp.lt.s32.totalorder %s650_s19, %s650_s19 }
  0x2e   :  { %798 = vmatprep.subr.bf16.mxu1 %v797_v18  ;;  %770 = vmatprep.subr.bf16.mxu0 %v769_v22  ;;  %v801_v31 = vpack.c.bf16 %v347_v29, %v346_v28  ;;  %v330_v33 = vld [vmem:[#allocation7 + $0x110] sm:$0xff]  ;;  %v331_v34 = vld [vmem:[#allocation7 + $0x118] sm:$0xff]  ;;  %v773_v35 = vpack.c.bf16 %v317_v32, %v316_v30  ;;  %v300_v37 = vld [vmem:[#allocation7 + $0x20] sm:$0xff]  ;;  %v956_v28 = vmov 1983009808   ;;  %p921_p2 = scmp.ne.s32.totalorder %s650_s19, %s920_s20  ;;  %p926_p4 = scmp.lt.s32.totalorder %s920_s20, %s920_s20 }
  0x2f   :  { %78 = vbcast.lane.b32.xlu1 %v76_v6, 256  ;;  %800 = vmatpush3.bf16.msra.mxu1 %v799_v26  ;;  %v803_v36 = vpack.c.bf16 %v331_v34, %v330_v33  ;;  %v301_v38 = vld [vmem:[#allocation7 + $0x28] sm:$0xff]  ;;  %v348_v39 = vld [vmem:[#allocation7 + $0x1a0] sm:$0xff]  ;;  %v318_v41 = vld [vmem:[#allocation7 + $0xb0] sm:$0xff]  ;;  %v194_v29 = vunpack.c.l.s4 %v956_v28 }
  0x30   :  { %802 = vmatprep.subr.bf16.mxu1 %v801_v31  ;;  %v349_v40 = vld [vmem:[#allocation7 + $0x1a8] sm:$0xff]  ;;  %v319_v42 = vld [vmem:[#allocation7 + $0xb8] sm:$0xff]  ;;  %v775_v43 = vpack.c.bf16 %v301_v38, %v300_v37  ;;  %v332_v45 = vld [vmem:[#allocation7 + $0x120] sm:$0xff]  ;;  %p927_p5 = por %p926_p4, %p925_p3 }
  0x31   :  { %772 = vmatpush3.bf16.msra.mxu0 %v771_v27  ;;  %v805_v44 = vpack.c.bf16 %v349_v40, %v348_v39  ;;  %v333_v46 = vld [vmem:[#allocation7 + $0x128] sm:$0xff]  ;;  %v777_v47 = vpack.c.bf16 %v319_v42, %v318_v41  ;;  %v55_v49 = vld [vmem:[#allocation4] sm:$0xff]  ;;  %v56_v50 = vld [vmem:[#allocation4 + $0x8] sm:$0xff]  ;;  %v195_v37 = vunpack.c.0.s8 %v194_v29 }
  0x32   :  { %774 = vmatprep.subr.bf16.mxu0 %v773_v35  ;;  %v807_v48 = vpack.c.bf16 %v333_v46, %v332_v45  ;;  %v57_v51 = vld [vmem:[#allocation4 + $0x10] sm:$0xff]  ;;  %v61_v52 = vunpack.c.l.bf16 %v55_v49  ;;  %v62_v53 = vunpack.c.h.bf16 %v55_v49  ;;  %v63_v54 = vunpack.c.l.bf16 %v56_v50  ;;  %v58_v38 = vld [vmem:[#allocation4 + $0x18] sm:$0xff]  ;;  %v59_v39 = vld [vmem:[#allocation4 + $0x20] sm:$0xff]  ;;  %p928_p6 = pnand %p927_p5, %p921_p2 }
  0x33   :  { %804 = vmatpush3.bf16.msra.mxu1 %v803_v36  ;;  %v64_v55 = vunpack.c.h.bf16 %v56_v50  ;;  %v65_v56 = vunpack.c.l.bf16 %v57_v51  ;;  %v66_v57 = vunpack.c.h.bf16 %v57_v51  ;;  %v267_v36 = vld [vmem:[#allocation3] sm:$0x3]  ;;  %v60_v41 = vld [vmem:[#allocation4 + $0x28] sm:$0xff]  ;;  %v68_v49 = vunpack.c.h.bf16 %v58_v38 }
  0x34   :  { %806 = vmatprep.subr.bf16.mxu1 %v805_v44  ;;  %v69_v50 = vunpack.c.l.bf16 %v59_v39  ;;  %v70_v51 = vunpack.c.h.bf16 %v59_v39  ;;  %v352_v39 = vld [vmem:[#allocation7 + $0x1c0] sm:$0xff] }
  0x35   :  { %776 = vmatpush3.bf16.msra.mxu0 %v775_v43 }
  0x36   :  { %778 = vmatprep.subr.bf16.mxu0 %v777_v47 }
  0x37   :  { %808 = vmatpush3.bf16.msra.mxu1 %v807_v48  ;;  %v67_v48 = vunpack.c.l.bf16 %v58_v38  ;;  %v305_v38 = vld [vmem:[#allocation7 + $0x48] sm:$0xff] }
  0x40   :  { %85 = vbcast.lane.b32.xlu0 %v83_v9, 256 }
  0xa1   :  { %v79_v58 = vpop.permute.xlu1 %78 }
  0xa2   :  { %vm87_vm2 = vcmp.ne.f32.partialorder %v79_v58, 0.0 }
  0xa3   :  { %v93_v59 = vsel %vm87_vm2, %v61_v52, 0.0  ;;  %v94_v60 = vsel %vm87_vm2, %v62_v53, 0.0  ;;  %v95_v61 = vsel %vm87_vm2, %v63_v54, 0.0  ;;  %v96_v62 = vsel %vm87_vm2, %v64_v55, 0.0 }
  0xa4   :  { %v107_v63 = vrot.slane %v93_v59, 4  ;;  %v113_v0 = vrot.slane %v94_v60, 4  ;;  %v97_v1 = vsel %vm87_vm2, %v65_v56, 0.0  ;;  %v98_v3 = vsel %vm87_vm2, %v66_v57, 0.0 }
  0xa5   :  { %v119_v4 = vrot.slane %v95_v61, 4  ;;  %v125_v5 = vrot.slane %v96_v62, 4  ;;  %v131_v8 = vrot.slane %v97_v1, 4  ;;  %v137_v9 = vrot.slane %v98_v3, 4 }
  0xa6   :  { %v108_v6 = vadd.f32 %v107_v63, %v93_v59  ;;  %v114_v7 = vadd.f32 %v113_v0, %v94_v60  ;;  %v1017_v52 = vsub.s32 %v195_v37, %v1008_v2  ;;  %v71_v53 = vunpack.c.l.bf16 %v60_v41 }
  0xa7   :  { %v120_v10 = vadd.f32 %v119_v4, %v95_v61  ;;  %v126_v11 = vadd.f32 %v125_v5, %v96_v62  ;;  %v132_v14 = vadd.f32 %v131_v8, %v97_v1  ;;  %v138_v15 = vadd.f32 %v137_v9, %v98_v3  ;;  %v302_v8 = vld [vmem:[#allocation7 + $0x30] sm:$0xff]  ;;  %v303_v9 = vld [vmem:[#allocation7 + $0x38] sm:$0xff] }
  0xa8   :  { %v109_v12 = vrot.slane %v108_v6, 2  ;;  %v115_v13 = vrot.slane %v114_v7, 2  ;;  %v72_v54 = vunpack.c.h.bf16 %v60_v41 }
  0xa9   :  { %v121_v16 = vrot.slane %v120_v10, 2  ;;  %v127_v17 = vrot.slane %v126_v11, 2  ;;  %v133_v20 = vrot.slane %v132_v14, 2  ;;  %v139_v21 = vrot.slane %v138_v15, 2 }
  0xaa   :  { %v110_v18 = vadd.f32 %v109_v12, %v108_v6  ;;  %v116_v19 = vadd.f32 %v115_v13, %v114_v7  ;;  %v779_v13 = vpack.c.bf16 %v303_v9, %v302_v8 }
  0xab   :  { %v122_v22 = vadd.f32 %v121_v16, %v120_v10  ;;  %v128_v23 = vadd.f32 %v127_v17, %v126_v11  ;;  %v134_v26 = vadd.f32 %v133_v20, %v132_v14  ;;  %v140_v27 = vadd.f32 %v139_v21, %v138_v15  ;;  %v351_v20 = vld [vmem:[#allocation7 + $0x1b8] sm:$0xff] }
  0xac   :  { %v111_v24 = vrot.slane %v110_v18, 1  ;;  %v117_v25 = vrot.slane %v116_v19, 1  ;;  %780 = vmatpush3.bf16.msra.mxu0 %v779_v13  ;;  %v309_v13 = vld [vmem:[#allocation7 + $0x68] sm:$0xff] }
  0xad   :  { %v123_v30 = vrot.slane %v122_v22, 1  ;;  %v129_v31 = vrot.slane %v128_v23, 1  ;;  %v135_v34 = vrot.slane %v134_v26, 1  ;;  %v141_v35 = vrot.slane %v140_v27, 1 }
  0xae   :  { %v112_v32 = vadd.f32 %v111_v24, %v110_v18  ;;  %v118_v33 = vadd.f32 %v117_v25, %v116_v19  ;;  %v350_v19 = vld [vmem:[#allocation7 + $0x1b0] sm:$0xff]  ;;  %v320_v25 = vld [vmem:[#allocation7 + $0xc0] sm:$0xff] }
  0xaf   :  { %v124_v42 = vadd.f32 %v123_v30, %v122_v22  ;;  %v130_v43 = vadd.f32 %v129_v31, %v128_v23  ;;  %v136_v45 = vadd.f32 %v135_v34, %v134_v26  ;;  %v142_v46 = vadd.f32 %v141_v35, %v140_v27  ;;  %v321_v26 = vld [vmem:[#allocation7 + $0xc8] sm:$0xff]  ;;  %v334_v27 = vld [vmem:[#allocation7 + $0x130] sm:$0xff] }
  0xb0   :  { %v191_v47 = vcombine.low %v112_v32, %v118_v33  ;;  %v809_v24 = vpack.c.bf16 %v351_v20, %v350_v19  ;;  %v335_v32 = vld [vmem:[#allocation7 + $0x138] sm:$0xff]  ;;  %v304_v33 = vld [vmem:[#allocation7 + $0x40] sm:$0xff]  ;;  %v357_v19 = vld [vmem:[#allocation7 + $0x1e8] sm:$0xff] }
  0xb1   :  { %v192_v56 = vcombine.low %v124_v42, %v130_v43  ;;  %v208_v58 = vcombine.low %v136_v45, %v142_v46  ;;  %v811_v37 = vpack.c.bf16 %v335_v32, %v334_v27  ;;  %v322_v45 = vld [vmem:[#allocation7 + $0xd0] sm:$0xff]  ;;  %v323_v46 = vld [vmem:[#allocation7 + $0xd8] sm:$0xff] }
  0xb2   :  { %v1021_v57 = vrot.slane %v191_v47, %v1017_v52  ;;  %810 = vmatprep.subr.bf16.mxu1 %v809_v24  ;;  %v336_v47 = vld [vmem:[#allocation7 + $0x140] sm:$0xff]  ;;  %v326_v20 = vld [vmem:[#allocation7 + $0xf0] sm:$0xff] }
  0xb3   :  { %v1024_v12 = vrot.slane %v192_v56, %v1017_v52  ;;  %v1027_v23 = vrot.slane %v208_v58, %v1017_v52  ;;  %812 = vmatpush3.bf16.msra.mxu1 %v811_v37  ;;  %v358_v37 = vld [vmem:[#allocation7 + $0x1f0] sm:$0xff] }
  0xb7   :  { %v271_v40 = vpop.xlane.xlu0 %270 }
  0xb8   :  { %v272_v44 = vadd.f32 %v271_v40, %v267_v36  ;;  %v781_v36 = vpack.c.bf16 %v321_v26, %v320_v25  ;;  %v353_v40 = vld [vmem:[#allocation7 + $0x1c8] sm:$0xff]  ;;  %v327_v26 = vld [vmem:[#allocation7 + $0xf8] sm:$0xff] }
  0xba   :  { %274 = vst.msk [vmem:[#allocation3] sm:$0x3] %vm52_vm0, %v272_v44  ;;  %782 = vmatprep.subr.bf16.mxu0 %v781_v36  ;;  %v311_v36 = vld [vmem:[#allocation7 + $0x78] sm:$0xff] }
  0xbb   :  { %v86_v55 = vpop.permute.xlu0 %85 }
  0xbc   :  { %vm88_vm3 = vcmp.ne.f32.partialorder %v86_v55, 0.0  ;;  %v307_v55 = vld [vmem:[#allocation7 + $0x58] sm:$0xff] }
  0xbd   :  { %v99_v59 = vsel %vm88_vm3, %v67_v48, 0.0  ;;  %v100_v60 = vsel %vm88_vm3, %v68_v49, 0.0  ;;  %v101_v61 = vsel %vm88_vm3, %v69_v50, 0.0  ;;  %v102_v62 = vsel %vm88_vm3, %v70_v51, 0.0 }
  0xbe   :  { %v103_v63 = vsel %vm88_vm3, %v71_v53, 0.0  ;;  %v104_v0 = vsel %vm88_vm3, %v72_v54, 0.0  ;;  %v143_v1 = vrot.slane %v99_v59, 4  ;;  %v149_v3 = vrot.slane %v100_v60, 4  ;;  %v337_v53 = vld [vmem:[#allocation7 + $0x148] sm:$0xff]  ;;  %v306_v54 = vld [vmem:[#allocation7 + $0x50] sm:$0xff] }
  0xbf   :  { %v155_v4 = vrot.slane %v101_v61, 4  ;;  %v161_v5 = vrot.slane %v102_v62, 4  ;;  %v167_v6 = vrot.slane %v103_v63, 4  ;;  %v173_v7 = vrot.slane %v104_v0, 4 }
  0xc0   :  { %v144_v10 = vadd.f32 %v143_v1, %v99_v59  ;;  %v150_v11 = vadd.f32 %v149_v3, %v100_v60  ;;  %v783_v50 = vpack.c.bf16 %v305_v38, %v304_v33  ;;  %v813_v51 = vpack.c.bf16 %v353_v40, %v352_v39  ;;  %v324_v3 = vld [vmem:[#allocation7 + $0xe0] sm:$0xff]  ;;  %v359_v38 = vld [vmem:[#allocation7 + $0x1f8] sm:$0xff] }
  0xc1   :  { %v280_v14 = vld [vmem:[#allocation3] sm:$0x3]  ;;  %v156_v15 = vadd.f32 %v155_v4, %v101_v61  ;;  %v162_v16 = vadd.f32 %v161_v5, %v102_v62  ;;  %v168_v17 = vadd.f32 %v167_v6, %v103_v63  ;;  %v174_v18 = vadd.f32 %v173_v7, %v104_v0  ;;  %v354_v61 = vld [vmem:[#allocation7 + $0x1d0] sm:$0xff]  ;;  %v355_v62 = vld [vmem:[#allocation7 + $0x1d8] sm:$0xff] }
  0xc2   :  { %283 = vperm.xlu1 %872, %v280_v14   ;;  %v145_v21 = vrot.slane %v144_v10, 2  ;;  %v151_v22 = vrot.slane %v150_v11, 2  ;;  %784 = vmatpush3.bf16.msra.mxu0 %v783_v50  ;;  %v785_v1 = vpack.c.bf16 %v323_v46, %v322_v45  ;;  %v325_v4 = vld [vmem:[#allocation7 + $0xe8] sm:$0xff]  ;;  %v338_v5 = vld [vmem:[#allocation7 + $0x150] sm:$0xff]  ;;  %v793_v33 = vpack.c.bf16 %v327_v26, %v326_v20  ;;  %v343_v50 = vld [vmem:[#allocation7 + $0x178] sm:$0xff] }
  0xc3   :  { %v157_v28 = vrot.slane %v156_v15, 2  ;;  %v163_v29 = vrot.slane %v162_v16, 2  ;;  %v169_v30 = vrot.slane %v168_v17, 2  ;;  %v175_v31 = vrot.slane %v174_v18, 2  ;;  %814 = vmatprep.subr.bf16.mxu1 %v813_v51  ;;  %v106_v45 = vld [vmem:[#allocation2 + $0x8] sm:$0xf] }
  0xc4   :  { %v146_v34 = vadd.f32 %v145_v21, %v144_v10  ;;  %v152_v35 = vadd.f32 %v151_v22, %v150_v11  ;;  %v339_v10 = vld [vmem:[#allocation7 + $0x158] sm:$0xff]  ;;  %v308_v11 = vld [vmem:[#allocation7 + $0x60] sm:$0xff]  ;;  %786 = vmatprep.subr.bf16.mxu0 %v785_v1  ;;  %v789_v24 = vpack.c.bf16 %v325_v4, %v324_v3 }
  0xc5   :  { %v158_v41 = vadd.f32 %v157_v28, %v156_v15  ;;  %v164_v42 = vadd.f32 %v163_v29, %v162_v16  ;;  %v170_v43 = vadd.f32 %v169_v30, %v168_v17  ;;  %v176_v44 = vadd.f32 %v175_v31, %v174_v18  ;;  %v356_v18 = vld [vmem:[#allocation7 + $0x1e0] sm:$0xff] }
  0xc6   :  { %v147_v48 = vrot.slane %v146_v34, 1  ;;  %v153_v49 = vrot.slane %v152_v35, 1  ;;  %v815_v15 = vpack.c.bf16 %v337_v53, %v336_v47  ;;  %v787_v16 = vpack.c.bf16 %v307_v55, %v306_v54  ;;  %v340_v30 = vld [vmem:[#allocation7 + $0x160] sm:$0xff]  ;;  %v377_v54 = vld [vmem:[#allocation7 + $0x288] sm:$0xff] }
  0xc7   :  { %v159_v56 = vrot.slane %v158_v41, 1  ;;  %v165_v58 = vrot.slane %v164_v42, 1  ;;  %v171_v59 = vrot.slane %v170_v43, 1  ;;  %v177_v60 = vrot.slane %v176_v44, 1  ;;  %v376_v51 = vld [vmem:[#allocation7 + $0x280] sm:$0xff] }
  0xc8   :  { %v148_v63 = vadd.f32 %v147_v48, %v146_v34  ;;  %v154_v0 = vadd.f32 %v153_v49, %v152_v35  ;;  %v817_v17 = vpack.c.bf16 %v355_v62, %v354_v61  ;;  %v819_v25 = vpack.c.bf16 %v339_v10, %v338_v5  ;;  %816 = vmatpush3.bf16.msra.mxu1 %v815_v15  ;;  %v341_v34 = vld [vmem:[#allocation7 + $0x168] sm:$0xff]  ;;  %v310_v35 = vld [vmem:[#allocation7 + $0x70] sm:$0xff]  ;;  %v379_v15 = vld [vmem:[#allocation7 + $0x298] sm:$0xff] }
  0xc9   :  { %v160_v6 = vadd.f32 %v159_v56, %v158_v41  ;;  %v166_v7 = vadd.f32 %v165_v58, %v164_v42  ;;  %v172_v8 = vadd.f32 %v171_v59, %v170_v43  ;;  %v178_v9 = vadd.f32 %v177_v60, %v176_v44  ;;  %788 = vmatpush3.bf16.msra.mxu0 %v787_v16  ;;  %v342_v49 = vld [vmem:[#allocation7 + $0x170] sm:$0xff] }
  0xca   :  { %v216_v14 = vcombine.low %v148_v63, %v154_v0  ;;  %v791_v28 = vpack.c.bf16 %v309_v13, %v308_v11  ;;  %v821_v29 = vpack.c.bf16 %v357_v19, %v356_v18  ;;  %818 = vmatprep.subr.bf16.mxu1 %v817_v17  ;;  %790 = vmatprep.subr.bf16.mxu0 %v789_v24  ;;  %v957_v61 = vmov 269488144   ;;  %v362_v18 = vld [vmem:[#allocation7 + $0x210] sm:$0xff]  ;;  %v363_v19 = vld [vmem:[#allocation7 + $0x218] sm:$0xff]  ;;  %v381_v24 = vld [vmem:[#allocation7 + $0x2a8] sm:$0xff] }
  0xcb   :  { %v217_v21 = vcombine.low %v160_v6, %v166_v7  ;;  %v233_v22 = vcombine.low %v172_v8, %v178_v9  ;;  %v207_v41 = vcombine.low %v1021_v57, %v1024_v12  ;;  %v823_v42 = vpack.c.bf16 %v341_v34, %v340_v30  ;;  %v360_v8 = vld [vmem:[#allocation7 + $0x200] sm:$0xff]  ;;  %v361_v9 = vld [vmem:[#allocation7 + $0x208] sm:$0xff]  ;;  %v383_v30 = vld [vmem:[#allocation7 + $0x2b8] sm:$0xff] }
  0xcc   :  { %v224_v27 = vrot.slane %v216_v14, %v1017_v52  ;;  %820 = vmatpush3.bf16.msra.mxu1 %v819_v25  ;;  %v795_v43 = vpack.c.bf16 %v311_v36, %v310_v35  ;;  %v825_v47 = vpack.c.bf16 %v359_v38, %v358_v37  ;;  %v827_v53 = vpack.c.bf16 %v343_v50, %v342_v49  ;;  %v378_v14 = vld [vmem:[#allocation7 + $0x290] sm:$0xff]  ;;  %v367_v34 = vld [vmem:[#allocation7 + $0x238] sm:$0xff]  ;;  %v384_v35 = vld [vmem:[#allocation7 + $0x2c0] sm:$0xff] }
  0xcd   :  { %v231_v31 = vrot.slane %v217_v21, %v1017_v52  ;;  %v240_v32 = vrot.slane %v233_v22, %v1017_v52  ;;  %792 = vmatpush3.bf16.msra.mxu0 %v791_v28  ;;  %822 = vmatprep.subr.bf16.mxu1 %v821_v29  ;;  %v286_v62 = vunpack.c.l.s4 %v957_v61  ;;  %v831_v17 = vpack.c.bf16 %v361_v9, %v360_v8  ;;  %v380_v22 = vld [vmem:[#allocation7 + $0x2a0] sm:$0xff]  ;;  %v365_v29 = vld [vmem:[#allocation7 + $0x228] sm:$0xff] }
  0xce   :  { %794 = vmatprep.subr.bf16.mxu0 %v793_v33  ;;  %v833_v21 = vpack.c.bf16 %v379_v15, %v378_v14  ;;  %v835_v26 = vpack.c.bf16 %v363_v19, %v362_v18  ;;  %v364_v28 = vld [vmem:[#allocation7 + $0x220] sm:$0xff]  ;;  %v366_v33 = vld [vmem:[#allocation7 + $0x230] sm:$0xff]  ;;  %v385_v36 = vld [vmem:[#allocation7 + $0x2c8] sm:$0xff] }
  0xcf   :  { %v232_v39 = vcombine.low %v224_v27, %v231_v31  ;;  %v256_v40 = vrot.slane %v240_v32, 7  ;;  %v287_v63 = vunpack.c.0.s8 %v286_v62  ;;  %v837_v27 = vpack.c.bf16 %v381_v24, %v380_v22 }
  0xd0   :  { %824 = vmatpush3.bf16.msra.mxu1 %v823_v42  ;;  %v839_v31 = vpack.c.bf16 %v365_v29, %v364_v28  ;;  %v843_v37 = vpack.c.bf16 %v367_v34, %v366_v33  ;;  %v845_v38 = vpack.c.bf16 %v385_v36, %v384_v35  ;;  %v387_v42 = vld [vmem:[#allocation7 + $0x2d8] sm:$0xff] }
  0xd1   :  { %v245_v44 = vrot.slane %v232_v39, 7  ;;  %v257_v46 = vsel %vm246_vm4, %v256_v40, %v1027_v23  ;;  %796 = vmatpush3.bf16.msra.mxu0 %v795_v43  ;;  %v829_v23 = vpack.c.bf16 %v377_v54, %v376_v51  ;;  %826 = vmatprep.subr.bf16.mxu1 %v825_v47  ;;  %v290_v0 = vsub.s32 %v287_v63, %v1008_v2  ;;  %v368_v39 = vld [vmem:[#allocation7 + $0x240] sm:$0xff] }
  0xd2   :  { %v258_v48 = vsel %vm248_vm5, %v256_v40, %v257_v46  ;;  %v371_v46 = vld [vmem:[#allocation7 + $0x258] sm:$0xff]  ;;  %v388_v47 = vld [vmem:[#allocation7 + $0x2e0] sm:$0xff] }
  0xd3   :  { %v247_v57 = vsel %vm246_vm4, %v245_v44, %v207_v41  ;;  %v259_v12 = vsel %vm250_vm6, %v256_v40, %v258_v48  ;;  %830 = vmatprep.subr.bf16.mxu0 %v829_v23  ;;  %v386_v41 = vld [vmem:[#allocation7 + $0x2d0] sm:$0xff]  ;;  %v389_v48 = vld [vmem:[#allocation7 + $0x2e8] sm:$0xff]  ;;  %v372_v51 = vld [vmem:[#allocation7 + $0x260] sm:$0xff] }
  0xd4   :  { %v249_v55 = vsel %vm248_vm5, %v245_v44, %v247_v57  ;;  %v260_v56 = vsel %vm252_vm7, %v256_v40, %v259_v12  ;;  %828 = vmatpush3.bf16.msra.mxu1 %v827_v53  ;;  %v369_v40 = vld [vmem:[#allocation7 + $0x248] sm:$0xff]  ;;  %v853_v50 = vpack.c.bf16 %v389_v48, %v388_v47  ;;  %v390_v12 = vld [vmem:[#allocation7 + $0x2f0] sm:$0xff]  ;;  %v391_v53 = vld [vmem:[#allocation7 + $0x2f8] sm:$0xff] }
  0xd5   :  { %v251_v58 = vsel %vm250_vm6, %v245_v44, %v249_v55  ;;  %v264_v59 = vadd.f32 %v260_v56, %v106_v45  ;;  %v847_v43 = vpack.c.bf16 %v369_v40, %v368_v39  ;;  %v370_v45 = vld [vmem:[#allocation7 + $0x250] sm:$0xff]  ;;  %v373_v57 = vld [vmem:[#allocation7 + $0x268] sm:$0xff]  ;;  %v857_v55 = vpack.c.bf16 %v391_v53, %v390_v12  ;;  %v375_v23 = vld [vmem:[#allocation7 + $0x278] sm:$0xff] }
  0xd6   :  { %v253_v60 = vsel %vm252_vm7, %v245_v44, %v251_v58  ;;  %v849_v44 = vpack.c.bf16 %v387_v42, %v386_v41  ;;  %v851_v49 = vpack.c.bf16 %v371_v46, %v370_v45  ;;  %v855_v54 = vpack.c.bf16 %v373_v57, %v372_v51  ;;  %v374_v56 = vld [vmem:[#allocation7 + $0x270] sm:$0xff] }
  0xd7   :  { %266 = vst [vmem:[#allocation2 + $0x8] sm:$0xf] %v264_v59  ;;  %v859_v58 = vpack.c.bf16 %v375_v23, %v374_v56 }
  0xde   :  { %v279_v5 = vld [vmem:[#allocation2 + $0x8] sm:$0xf] }
 0x141   :  { %v284_v1 = vpop.permute.xlu1 %283 }
 0x142   :  { %v291_v3 = vrot.slane %v284_v1, %v290_v0 }
 0x144   :  { %874 = vrcp.f32 %v291_v3 }
 0x14e   :  { %v875_v4 = vpop.eup %874 }
 0x14f   :  { %v294_v6 = vmul.f32 %v875_v4, %v253_v60  ;;  %v295_v7 = vmul.f32 %v875_v4, %v279_v5  ;;  %v659_v60 = vld [vmem:[%s1070_s3] ss:$0 sm:$0xff] }
 0x151   :  { %v408_v10 = vrot.slane %v294_v6, %v1017_v52  ;;  %v401_v11 = vcombine.high %v294_v6, %v294_v6  ;;  %v1046_v13 = vrot.slane %v295_v7, %v1017_v52 }
 0x153   :  { %v416_v16 = vcombine.high %v408_v10, %v408_v10  ;;  %v415_v2 = vrot.slane %v401_v11, %v1017_v52  ;;  %v425_v25 = vcombine.high %v1046_v13, %v1046_v13  ;;  %v382_v52 = vld [vmem:[#allocation7 + $0x2b0] sm:$0xff] }
 0x154   :  { %v841_v32 = vpack.c.bf16 %v383_v30, %v382_v52 }
 0x155   :  { %496 = vmatprep.mubr.f32.mxu0 %v416_v16  ;;  %v417_v20 = vcombine.high %v415_v2, %v415_v2 }
 0x156   :  { %497 = vmatmul.mubr.f32.vlgmr.msra.gmra.mrb[0].mxu0 %v408_v10 }
 0x157   :  { %832 = vmatpush3.bf16.msra.mxu0 %v831_v17  ;;  %566 = vmatprep.mubr.f32.mxu1 %v417_v20 }
 0x158   :  { %636 = vmatprep.mubr.f32.mxu0 %v425_v25  ;;  %567 = vmatmul.mubr.f32.vlgmr.msra.gmra.mrb[0].mxu1 %v415_v2 }
 0x159   :  { %834 = vmatprep.subr.bf16.mxu0 %v833_v21 }
 0x15b   :  { %836 = vmatpush3.bf16.msra.mxu0 %v835_v26 }
 0x15c   :  { %838 = vmatprep.subr.bf16.mxu0 %v837_v27 }
 0x15f   :  { %840 = vmatpush3.bf16.msra.mxu0 %v839_v31 }
 0x160   :  { %842 = vmatprep.subr.bf16.mxu0 %v841_v32 }
 0x163   :  { %844 = vmatpush3.bf16.msra.mxu0 %v843_v37 }
 0x164   :  { %846 = vmatprep.subr.bf16.mxu0 %v845_v38 }
 0x167   :  { %848 = vmatpush3.bf16.msra.mxu0 %v847_v43 }
 0x168   :  { %850 = vmatprep.subr.bf16.mxu0 %v849_v44 }
 0x16b   :  { %852 = vmatpush3.bf16.msra.mxu0 %v851_v49 }
 0x16c   :  { %854 = vmatprep.subr.bf16.mxu0 %v853_v50 }
 0x16f   :  { %856 = vmatpush3.bf16.msra.mxu0 %v855_v54 }
 0x170   :  { %858 = vmatprep.subr.bf16.mxu0 %v857_v55 }
 0x173   :  { %860 = vmatpush3.bf16.msra.mxu0 %v859_v58 }
 0x176   :  { %637 = vmatmul.mubr.f32.vlgmr.msra.gmra.mrb[2].mxu0 %v1046_v13 }
 0x229   :  { %v692_v59 = vpop.f32.mrb[0].mxu0 }
 0x22a   :  { %v693_v61 = vpop.f32.mrb[1].mxu0 }
 0x22b   :  { %v694_v62 = vadd.f32 %v693_v61, %v692_v59  ;;  %v727_v63 = vpop.f32.mrb[0].mxu1 }
 0x22c   :  { %v728_v0 = vpop.f32.mrb[1].mxu1 }
 0x22d   :  { %v499_v1 = vadd.f32 %v694_v62, %v659_v60  ;;  %v729_v3 = vadd.f32 %v728_v0, %v727_v63 }
 0x22f   :  { %v569_v4 = vadd.f32 %v729_v3, %v499_v1 }
 0x249   :  { %v762_v5 = vpop.f32.mrb[2].mxu0 }
 0x24a   :  { %v763_v6 = vpop.f32.mrb[3].mxu0 }
 0x24b   :  { %v764_v7 = vadd.f32 %v763_v6, %v762_v5 }
 0x24d   :  { %v639_v8 = vadd.f32 %v764_v7, %v569_v4 }
 0x24f   :  { %642 = vst [vmem:[#allocation9] sm:$0x3] %v639_v8 }
 0x250   :  { %931 = shalt.err (!%p928_p6)
}
 0x251   :  { %s932_s22 = scalar_lea.hbm %s1071_s4, 32 }
 0x252   :  { %p933_p7 = scmp.ne.s32.totalorder %s1071_s4, %s932_s22  ;;  %p936_p8 = scmp.lt.u32.totalorder %s932_s22, %s1071_s4 }
 0x254   :  { %p938_p9 = pnand %p936_p8, %p933_p7 }
 0x256   :  { %941 = shalt.err (!%p938_p9)
}
 0x257   :  { %652 = dma.vmem_to_hbm [thread:$0]  %s650_s19, 32, %s1071_s4, [#allocation6]  }
 0x258   :  { %946 = dma.done.wait [#allocation6], 32  }
 0x259   :  { %947 = vsyncadd [#allocation6], 4294967264 }
 0x25a   :  { %656 = vsyncpa [#allocation5], 1 }
 0x25b   :  { %657 = vsyncpa [#allocation8], 1 }
 0x25c   :  { %658 = vsyncpa [#allocation6], 1 }

</bundles_post_ra>
